<compile_context>
chip_gen: v6e
topology: v6e:2x2x1
jax: 0.10.0
libtpu: 0.0.40
codegen_flags: <defaults>
</compile_context>

<pallas_src>
import jax
import jax.numpy as jnp
from jax.experimental import pallas as pl
from jax.experimental.pallas import tpu as pltpu

# NNUE hyper-parameters (module-level constants in the original script).
INPUT_SIZE = 256
HL_SIZE = 128
QA = 255
QB = 64
SCALE = 400


def _nnue_kernel(xw_ref, xb_ref, w_ref, b_ref, ow_ref, stm_ref, ob_ref, out_ref):
    W = w_ref[...]                     # (IN, HL)  bf16, resident across grid steps
    bias = b_ref[...]                  # (1, HL)   f32, broadcasts over batch tile

    # int8 0/1 features -> bf16 (exact) right before the MXU; the cast is VPU
    # work hidden under the feature DMA.
    xw = xw_ref[...].astype(jnp.bfloat16)
    xb = xb_ref[...].astype(jnp.bfloat16)

    # Accumulator layer (shared weights for white / black feature sets),
    # bf16 x bf16 on the MXU with f32 accumulation.
    wa = jnp.dot(xw, W, preferred_element_type=jnp.float32) + bias
    ba = jnp.dot(xb, W, preferred_element_type=jnp.float32) + bias

    # clamp(x, 0, QA)  (clipped ReLU)
    wa = jnp.clip(wa, 0.0, float(QA))
    ba = jnp.clip(ba, 0.0, float(QA))

    # Output layer with the side-to-move select folded algebraically:
    #   white to move: ev = wa . ow0 + ba . ow1
    #   black to move: ev = ba . ow0 + wa . ow1
    #                    = (wa . ow0 + ba . ow1) + (ba - wa) . (ow0 - ow1)
    ow0 = ow_ref[0:1, :]               # (1, HL)  first half of output weights
    ow1 = ow_ref[1:2, :]               # (1, HL)  second half
    d = ow0 - ow1                      # (1, HL)

    base = jnp.sum(wa * ow0 + ba * ow1, axis=-1, keepdims=True)    # (TB, 1)
    delta = jnp.sum((ba - wa) * d, axis=-1, keepdims=True)         # (TB, 1)

    is_black = (stm_ref[...] != 0.0).astype(jnp.float32)           # (TB, 1)
    ev = base + is_black * delta + ob_ref[0]                       # SMEM scalar bias

    out_ref[...] = ev * (float(SCALE) / float(QA * QB))


def _round_down(x, m):
    return (x // m) * m


def nnue_forward(x_white, x_black, side_to_move, acc_w, acc_b, out_w, out_b,
                 *, batch_tile=2048):
    """Pallas implementation of NNUE.forward.

    x_white, x_black: (B, INPUT_SIZE) binary (0/1) feature planes.
    acc_w:  (INPUT_SIZE, HL_SIZE)  -- transposed nn.Linear weight
    acc_b:  (HL_SIZE,)
    out_w:  (2 * HL_SIZE, 1)
    out_b:  (1,)
    side_to_move: (B,) or (B, 1)

    batch_tile: sweep 1024-4096 on real batch sizes; int8 features keep even
    TB=4096 at ~4 MiB of double-buffered input.
    """
    B, IN = x_white.shape
    HL = acc_w.shape[1]

    # ---- batch-tile selection ------------------------------------------------
    TB = min(batch_tile, max(B, 32))
    if B >= 256:
        # Keep >= 2 grid steps so dimension_semantics=("parallel",) can shard
        # the batch axis across both v7x TensorCores.
        TB = min(TB, max(128, _round_down(B // 2, 128)))
    TB = max(32, _round_down(TB, 32))   # sublane-friendly for int8 (32,128) tiling

    pad = (-B) % TB
    Bp = B + pad

    # Narrow dtypes: features are exact 0/1 -> int8 halves the dominant HBM
    # stream; accumulator weights in bf16 for the native MXU path (f32
    # accumulation inside the kernel).
    xw = x_white.astype(jnp.int8)
    xb = x_black.astype(jnp.int8)
    stm_flat = jnp.asarray(side_to_move).reshape(-1).astype(jnp.float32)
    if pad:
        xw = jnp.pad(xw, ((0, pad), (0, 0)))
        xb = jnp.pad(xb, ((0, pad), (0, 0)))
        stm_flat = jnp.pad(stm_flat, (0, pad))

    w = acc_w.astype(jnp.bfloat16)                    # (IN, HL)
    b2 = acc_b.reshape(1, HL).astype(jnp.float32)     # (1, HL)
    ow2 = out_w.reshape(2, HL).astype(jnp.float32)    # row 0 = first half, row 1 = second half
    ob1 = out_b.reshape(1).astype(jnp.float32)        # SMEM scalar
    stm2 = stm_flat.reshape(Bp, 1)

    grid = (Bp // TB,)

    out = pl.pallas_call(
        _nnue_kernel,
        out_shape=jax.ShapeDtypeStruct((Bp, 1), jnp.float32),
        grid_spec=pltpu.PrefetchScalarGridSpec(
            num_scalar_prefetch=0,
            grid=grid,
            in_specs=[
                pl.BlockSpec((TB, IN), lambda i: (i, 0)),    # x_white tile (int8)
                pl.BlockSpec((TB, IN), lambda i: (i, 0)),    # x_black tile (int8)
                pl.BlockSpec((IN, HL), lambda i: (0, 0)),    # accumulator weight (resident, bf16)
                pl.BlockSpec((1, HL), lambda i: (0, 0)),     # accumulator bias
                pl.BlockSpec((2, HL), lambda i: (0, 0)),     # output weights
                pl.BlockSpec((TB, 1), lambda i: (i, 0)),     # side_to_move tile
                pl.BlockSpec(memory_space=pltpu.MemorySpace.SMEM),  # output bias scalar
            ],
            out_specs=pl.BlockSpec((TB, 1), lambda i: (i, 0)),
        ),
        compiler_params=pltpu.CompilerParams(
            dimension_semantics=("parallel",),
            # v5e's default scoped VMEM (16 MiB) blocks large batch tiles; 48 MiB
            # covers TB=4096 with headroom and stays under v7x's 64 MiB physical.
            vmem_limit_bytes=48 * 1024 * 1024,
        ),
    )(xw, xb, w, b2, ow2, stm2, ob1)

    return out[:B]


def nnue_forward_ref(x_white, x_black, side_to_move, acc_w, acc_b, out_w, out_b):
    """Plain-JAX reference mirroring the PyTorch forward()."""
    wa = jnp.clip(x_white @ acc_w + acc_b, 0.0, float(QA))
    ba = jnp.clip(x_black @ acc_w + acc_b, 0.0, float(QA))
    stm = jnp.asarray(side_to_move).reshape(-1, 1).astype(bool)
    combined = jnp.where(stm,
                         jnp.concatenate([ba, wa], axis=1),
                         jnp.concatenate([wa, ba], axis=1))
    eval_raw = combined @ out_w + out_b
    return eval_raw * SCALE / (QA * QB)


if __name__ == "__main__":
    key = jax.random.PRNGKey(0)
    k_xw, k_xb, k_stm, k_w, k_b, k_ow, k_ob = jax.random.split(key, 7)

    B = 256

    # Sparse-ish binary feature inputs (like NNUE piece-square features).
    x_white = (jax.random.uniform(k_xw, (B, INPUT_SIZE)) < 0.1).astype(jnp.float32)
    x_black = (jax.random.uniform(k_xb, (B, INPUT_SIZE)) < 0.1).astype(jnp.float32)
    side_to_move = jax.random.bernoulli(k_stm, 0.5, (B,)).astype(jnp.float32)

    # Parameter init matching shapes of the PyTorch module:
    #   accumulator.weight: (HL, IN) kaiming_normal(relu) -> std = sqrt(2/IN)
    #   accumulator.bias:   (HL,)
    #   output_weights:     (2*HL, 1)
    #   output_bias:        (1,)
    acc_weight = jax.random.normal(k_w, (HL_SIZE, INPUT_SIZE)) * jnp.sqrt(2.0 / INPUT_SIZE)
    acc_w = acc_weight.T.astype(jnp.float32)                        # (IN, HL)
    # The kernel runs the accumulator matmul in bf16; quantize the weights once
    # so the f32 reference sees the exact same values (products with 0/1
    # features are then exact and only accumulation order differs).
    acc_w = acc_w.astype(jnp.bfloat16).astype(jnp.float32)
    acc_b = (jax.random.uniform(k_b, (HL_SIZE,)) * 0.2 - 0.1).astype(jnp.float32)
    out_w = jax.random.normal(k_ow, (2 * HL_SIZE, 1)).astype(jnp.float32)
    out_b = jax.random.normal(k_ob, (1,)).astype(jnp.float32)

    # B=256 with the default tile logic gives TB=128 -> grid=(2,), so both v7x
    # TensorCores get a tile even at this small test size.
    out = nnue_forward(x_white, x_black, side_to_move, acc_w, acc_b, out_w, out_b)
    out = jax.block_until_ready(out)

    ref = nnue_forward_ref(x_white, x_black, side_to_move, acc_w, acc_b, out_w, out_b)
    assert out.shape == (B, 1)
    max_err = jnp.max(jnp.abs(out - ref))
    assert jnp.allclose(out, ref, atol=5e-2, rtol=1e-3), f"mismatch vs reference (max_err={max_err})"

    print("KERNEL_OK")
</pallas_src>

<mosaic_0001>
module attributes {stable_mosaic.version = 11 : i64} {
  func.func @_nnue_kernel(%arg0: i32, %arg1: memref<128x256xi8, #tpu.memory_space<vmem>>, %arg2: memref<128x256xi8, #tpu.memory_space<vmem>>, %arg3: memref<256x128xbf16, #tpu.memory_space<vmem>>, %arg4: memref<1x128xf32, #tpu.memory_space<vmem>>, %arg5: memref<2x128xf32, #tpu.memory_space<vmem>>, %arg6: memref<128x1xf32, #tpu.memory_space<vmem>>, %arg7: memref<1xf32, #tpu.memory_space<smem>>, %arg8: memref<128x1xf32, #tpu.memory_space<vmem>>) attributes {dimension_semantics = [#tpu.dimension_semantics<parallel>], iteration_bounds = array<i64: 2>, scalar_prefetch = 0 : i64, scratch_operands = 0 : i64, tpu.core_type = #tpu.core_type<tc>, window_params = [{transform_indices = @transform_0, window_bounds = array<i64: 128, 256>}, {transform_indices = @transform_1, window_bounds = array<i64: 128, 256>}, {pipeline_mode = #tpu.pipeline_mode<synchronous>, transform_indices = @transform_2, window_bounds = array<i64: 256, 128>}, {pipeline_mode = #tpu.pipeline_mode<synchronous>, transform_indices = @transform_3, window_bounds = array<i64: 1, 128>}, {pipeline_mode = #tpu.pipeline_mode<synchronous>, transform_indices = @transform_4, window_bounds = array<i64: 2, 128>}, {transform_indices = @transform_5, window_bounds = array<i64: 128, 1>}, {transform_indices = @transform_6, window_bounds = array<i64: 1>}, {transform_indices = @transform_7, window_bounds = array<i64: 128, 1>}]} {
    %c0 = arith.constant 0 : index
    %c0_0 = arith.constant 0 : index
    %0 = vector.load %arg3[%c0, %c0_0] : memref<256x128xbf16, #tpu.memory_space<vmem>>, vector<256x128xbf16>
    %c0_1 = arith.constant 0 : index
    %c0_2 = arith.constant 0 : index
    %1 = vector.load %arg4[%c0_1, %c0_2] : memref<1x128xf32, #tpu.memory_space<vmem>>, vector<1x128xf32>
    %c0_3 = arith.constant 0 : index
    %c0_4 = arith.constant 0 : index
    %2 = vector.load %arg1[%c0_3, %c0_4] : memref<128x256xi8, #tpu.memory_space<vmem>>, vector<128x256xi8>
    %3 = arith.sitofp %2 : vector<128x256xi8> to vector<128x256xbf16>
    %c0_5 = arith.constant 0 : index
    %c0_6 = arith.constant 0 : index
    %4 = vector.load %arg2[%c0_5, %c0_6] : memref<128x256xi8, #tpu.memory_space<vmem>>, vector<128x256xi8>
    %5 = arith.sitofp %4 : vector<128x256xi8> to vector<128x256xbf16>
    %cst = arith.constant dense<0.000000e+00> : vector<128x128xf32>
    %6 = tpu.matmul %3, %0, %cst {dimension_numbers = #tpu.dot_dimension_numbers<[1], [0], [0], [1], [0, 0, 1, 1], [], []>} : vector<128x256xbf16>, vector<256x128xbf16>, vector<128x128xf32> -> vector<128x128xf32>
    %7 = vector.broadcast %1 : vector<1x128xf32> to vector<128x128xf32>
    %8 = arith.addf %6, %7 : vector<128x128xf32>
    %cst_7 = arith.constant dense<0.000000e+00> : vector<128x128xf32>
    %9 = tpu.matmul %5, %0, %cst_7 {dimension_numbers = #tpu.dot_dimension_numbers<[1], [0], [0], [1], [0, 0, 1, 1], [], []>} : vector<128x256xbf16>, vector<256x128xbf16>, vector<128x128xf32> -> vector<128x128xf32>
    %10 = vector.broadcast %1 : vector<1x128xf32> to vector<128x128xf32>
    %11 = arith.addf %9, %10 : vector<128x128xf32>
    %cst_8 = arith.constant 0.000000e+00 : f32
    %cst_9 = arith.constant 2.550000e+02 : f32
    %12 = vector.broadcast %cst_8 : f32 to vector<128x128xf32>
    %13 = arith.maximumf %12, %8 : vector<128x128xf32>
    %14 = vector.broadcast %cst_9 : f32 to vector<128x128xf32>
    %15 = arith.minimumf %14, %13 : vector<128x128xf32>
    %cst_10 = arith.constant 0.000000e+00 : f32
    %cst_11 = arith.constant 2.550000e+02 : f32
    %16 = vector.broadcast %cst_10 : f32 to vector<128x128xf32>
    %17 = arith.maximumf %16, %11 : vector<128x128xf32>
    %18 = vector.broadcast %cst_11 : f32 to vector<128x128xf32>
    %19 = arith.minimumf %18, %17 : vector<128x128xf32>
    %c0_12 = arith.constant 0 : index
    %c0_13 = arith.constant 0 : index
    %20 = vector.load %arg5[%c0_12, %c0_13] : memref<2x128xf32, #tpu.memory_space<vmem>>, vector<1x128xf32>
    %c1 = arith.constant 1 : index
    %c0_14 = arith.constant 0 : index
    %21 = vector.load %arg5[%c1, %c0_14] : memref<2x128xf32, #tpu.memory_space<vmem>>, vector<1x128xf32>
    %22 = arith.subf %20, %21 : vector<1x128xf32>
    %23 = vector.broadcast %20 : vector<1x128xf32> to vector<128x128xf32>
    %24 = arith.mulf %15, %23 : vector<128x128xf32>
    %25 = vector.broadcast %21 : vector<1x128xf32> to vector<128x128xf32>
    %26 = arith.mulf %19, %25 : vector<128x128xf32>
    %27 = arith.addf %24, %26 : vector<128x128xf32>
    %cst_15 = arith.constant dense<0.000000e+00> : vector<128xf32>
    %28 = vector.multi_reduction <add>, %27, %cst_15 [1] : vector<128x128xf32> to vector<128xf32>
    %29 = vector.shape_cast %28 : vector<128xf32> to vector<128x1xf32>
    %30 = arith.subf %19, %15 : vector<128x128xf32>
    %31 = vector.broadcast %22 : vector<1x128xf32> to vector<128x128xf32>
    %32 = arith.mulf %30, %31 : vector<128x128xf32>
    %cst_16 = arith.constant dense<0.000000e+00> : vector<128xf32>
    %33 = vector.multi_reduction <add>, %32, %cst_16 [1] : vector<128x128xf32> to vector<128xf32>
    %34 = vector.shape_cast %33 : vector<128xf32> to vector<128x1xf32>
    %c0_17 = arith.constant 0 : index
    %c0_18 = arith.constant 0 : index
    %35 = vector.load %arg6[%c0_17, %c0_18] : memref<128x1xf32, #tpu.memory_space<vmem>>, vector<128x1xf32>
    %cst_19 = arith.constant 0.000000e+00 : f32
    %36 = vector.broadcast %cst_19 : f32 to vector<128x1xf32>
    %37 = arith.cmpf one, %35, %36 : vector<128x1xf32>
    %38 = arith.extui %37 : vector<128x1xi1> to vector<128x1xi32>
    %39 = arith.sitofp %38 : vector<128x1xi32> to vector<128x1xf32>
    %40 = arith.mulf %39, %34 : vector<128x1xf32>
    %41 = arith.addf %29, %40 : vector<128x1xf32>
    %c0_20 = arith.constant 0 : index
    %42 = memref.load %arg7[%c0_20] : memref<1xf32, #tpu.memory_space<smem>>
    %43 = vector.broadcast %42 : f32 to vector<128x1xf32>
    %44 = arith.addf %41, %43 : vector<128x1xf32>
    %cst_21 = arith.constant 0.0245098043 : f32
    %45 = vector.broadcast %cst_21 : f32 to vector<128x1xf32>
    %46 = arith.mulf %44, %45 : vector<128x1xf32>
    %c0_22 = arith.constant 0 : index
    %c0_23 = arith.constant 0 : index
    %47 = vector.load %arg8[%c0_22, %c0_23] : memref<128x1xf32, #tpu.memory_space<vmem>>, vector<128x1xf32>
    tpu.vector_store %arg8[%c0_22, %c0_23], %46 {strides = array<i32>} : memref<128x1xf32, #tpu.memory_space<vmem>>, vector<128x1xf32>,
    return
  }
  func.func @transform_0(%arg0: i32) -> (i32, i32) {
    %c0_i32 = arith.constant 0 : i32
    %c0_i32_0 = arith.constant 0 : i32
    return %arg0, %c0_i32 : i32, i32
  }
  func.func @transform_1(%arg0: i32) -> (i32, i32) {
    %c0_i32 = arith.constant 0 : i32
    %c0_i32_0 = arith.constant 0 : i32
    return %arg0, %c0_i32 : i32, i32
  }
  func.func @transform_2(%arg0: i32) -> (i32, i32) {
    %c0_i32 = arith.constant 0 : i32
    %c0_i32_0 = arith.constant 0 : i32
    %c0_i32_1 = arith.constant 0 : i32
    return %c0_i32, %c0_i32_0 : i32, i32
  }
  func.func @transform_3(%arg0: i32) -> (i32, i32) {
    %c0_i32 = arith.constant 0 : i32
    %c0_i32_0 = arith.constant 0 : i32
    %c0_i32_1 = arith.constant 0 : i32
    return %c0_i32, %c0_i32_0 : i32, i32
  }
  func.func @transform_4(%arg0: i32) -> (i32, i32) {
    %c0_i32 = arith.constant 0 : i32
    %c0_i32_0 = arith.constant 0 : i32
    %c0_i32_1 = arith.constant 0 : i32
    return %c0_i32, %c0_i32_0 : i32, i32
  }
  func.func @transform_5(%arg0: i32) -> (i32, i32) {
    %c0_i32 = arith.constant 0 : i32
    %c0_i32_0 = arith.constant 0 : i32
    return %arg0, %c0_i32 : i32, i32
  }
  func.func @transform_6(%arg0: i32) -> i32 {
    %c0_i32 = arith.constant 0 : i32
    %c0_i32_0 = arith.constant 0 : i32
    return %c0_i32 : i32
  }
  func.func @transform_7(%arg0: i32) -> (i32, i32) {
    %c0_i32 = arith.constant 0 : i32
    %c0_i32_0 = arith.constant 0 : i32
    return %arg0, %c0_i32 : i32, i32
  }
}

</mosaic_0001>

<bundles_post_ra>
// kernel: tpu_custom_call.1
= control target key start
LH: loop header
LB: loop body
LE: loop exit
PB: predicated region body
PF: predicated region fallthrough
CT: control target
= control target key end

     0   :  { %s1741_s0 = inlined_call_operand.vmem [shape: s8[256,256], index: 0, kind: input, shape index: {}]   ;;  %s1742_s1 = inlined_call_operand.vmem [shape: s8[256,256], index: 1, kind: input, shape index: {}]   ;;  %s1743_s2 = inlined_call_operand.hbm [shape: bf16[256,128], index: 2, kind: input, shape index: {}]   ;;  %s1744_s3 = inlined_call_operand.vmem [shape: f32[1,128], index: 3, kind: input, shape index: {}]   ;;  %s1745_s4 = inlined_call_operand.vmem [shape: f32[2,128], index: 4, kind: input, shape index: {}]   ;;  %s1746_s5 = inlined_call_operand.vmem [shape: f32[256,1], index: 5, kind: input, shape index: {}]   ;;  %s1747_s6 = inlined_call_operand.<no memory space> [shape: f32[1], index: 6, kind: input, shape index: {}]   ;;  %s1748_s7 = inlined_call_operand.vmem [shape: f32[256,1], index: 7, kind: output, shape index: {}]  }
   0x1   :  { %12 = sst [smem:[#allocation2]] %s1747_s6 }
   0x2   :  { %13 = vsyncpa [#allocation4], 0  ;;  %s1493_s26 = smov 0  }
   0x3 LB: > { %s1499_s27 = sadd.s32 4294967295, %s1444_s26   ;;  %p1190_p0 = scmp.ge.s32.totalorder %s1444_s26, 1  ;;  %s1444_s26 = sphi %s1493_s26, %s19_s26  }
   0x4   : > { %p212_p1 = scmp.lt.s32.totalorder %s1444_s26, 3  ;;  %s1446_s28 = smov [#allocation3]  }
   0x5   : > { %s224_s29 = sshll.u32 %s1446_s28, 4  ;;  %p1378_p3 = scmp.eq.s32.totalorder %s1499_s27, 0  ;;  %s225_s29 = int_to_ptr.vmem [resolvable:$true] %s224_s29 }
   0x6   : > { %p1503_p2 = pnand %p1190_p0, %p212_p1  ;;  %s1419_s30 = scalar_lea.vmem %s225_s29, 2048 }
   0x7   : > { %p1420_p7 = scmp.ne.s32.totalorder %s225_s29, %s1419_s30  ;;  %p1427_p10 = scmp.lt.s32.totalorder %s225_s29, %s225_s29 }
   0x8   : > { %p1374_p4 = pneg %p1503_p2  ;;  %p1428_p11 = scmp.lt.s32.totalorder %s1419_s30, %s1419_s30 }
   0xa   : > { %p1375_p5 = pnand %p1378_p3, %p1374_p4  ;;  %p1429_p12 = por %p1428_p11, %p1427_p10 }
   0xc   : > { %p1410_p6 = pneg %p1375_p5 }
   0xe   : > { %p1422_p8 = pnand %p1420_p7, %p1410_p6 }
  0x10   : > { %p1423_p9 = pneg %p1422_p8 }
  0x12   : > { %p1430_p13 = pnand %p1429_p12, %p1423_p9 }
  0x14   : > { %1433 = shalt.err (!%p1430_p13)
}
  0x15   : > { %s1447_s8 = smov 64   ;;  %s1448_s9 = smov 4  }
  0x16   : > { %1377 = dma.hbm_to_vmem [thread:$0]  (!%p1375_p5), %s1743_s2, 2048, %s225_s29, [#allocation4], %s1447_s8, %s1447_s8, %s1448_s9  }
  0x17   : > { %278 = sbr.rel (%p1503_p2) target bundleno = 479 (0x1df), region = 48 }
  0x1c   : > { %1439 = dma.done.wait (%p1378_p3), [#allocation4], 2048  }
  0x1d   : > { %1441 = vsyncadd (%p1378_p3), [#allocation4], 4294965248  ;;  %s1195_s12 = sshll.u32 %s1499_s27, 2  ;;  %v1392_v0 = vld [vmem:[#allocation3 + $0x78] sm:$0xff]   ;;  %v1394_v2 = vld [vmem:[#allocation3 + $0x70] sm:$0xff]   ;;  %s1201_s28 = sshll.u32 %s1499_s27, 4 }
  0x1e   : > { %v1393_v1 = vld [vmem:[#allocation3 + $0x38] sm:$0xff]   ;;  %1242 = vmatprep.subr.bf16.mxu0 %v1392_v0  ;;  %1306 = vmatprep.subr.bf16.mxu1 %v1392_v0  ;;  %p323_p0 = scmp.lt.s32.totalorder %s1195_s12, 7  ;;  %v1395_v3 = vld [vmem:[#allocation3 + $0x30] sm:$0xff]   ;;  %v1396_v4 = vld [vmem:[#allocation3 + $0x68] sm:$0xff]   ;;  %v793_v0 = vlaneseq  ;;  %p337_p1 = scmp.lt.s32.totalorder %s1201_s28, 31  ;;  %vm1079_vm3 = vcmask 7168  }
  0x1f   : > { %1243 = vmatpush3.bf16.msra.mxu0 %v1393_v1  ;;  %1307 = vmatpush3.bf16.msra.mxu1 %v1393_v1  ;;  %v1397_v5 = vld [vmem:[#allocation3 + $0x28] sm:$0xff]   ;;  %v1398_v6 = vld [vmem:[#allocation3 + $0x60] sm:$0xff]   ;;  %v1400_v8 = vld [vmem:[#allocation3 + $0x58] sm:$0xff]   ;;  %s1045_s9 = sld [smem:[#allocation2]] }
  0x20   : > { %1244 = vmatprep.subr.bf16.mxu0 %v1394_v2  ;;  %1308 = vmatprep.subr.bf16.mxu1 %v1394_v2  ;;  %s1751_s12 = smov (!%p323_p0, %s1195_s12), 7  ;;  %v1399_v7 = vld [vmem:[#allocation3 + $0x20] sm:$0xff]   ;;  %v1401_v9 = vld [vmem:[#allocation3 + $0x18] sm:$0xff]   ;;  %v1402_v10 = vld [vmem:[#allocation3 + $0x50] sm:$0xff]   ;;  %s1753_s28 = smov (!%p337_p1, %s1201_s28), 31 }
  0x21   : > { %s1240_s13 = sshll.u32 %s1751_s12, 4  ;;  %v1403_v15 = vld [vmem:[#allocation3 + $0x10] sm:$0xff]   ;;  %v1404_v16 = vld [vmem:[#allocation3 + $0x48] sm:$0xff]   ;;  %v1406_v18 = vld [vmem:[#allocation3 + $0x40] sm:$0xff]   ;;  %s1202_s29 = sshll.u32 %s1753_s28, 3 }
  0x22   : > { %s1525_s16 = scalar_lea.vmem %s1741_s0, %s1240_s13  ;;  %s1530_s19 = scalar_lea.vmem %s1742_s1, %s1240_s13  ;;  %v1405_v17 = vld [vmem:[#allocation3 + $0x8] sm:$0xff]   ;;  %v1407_v19 = vld [vmem:[#allocation3] sm:$0xff]  }
  0x23   : > { %1245 = vmatpush3.bf16.msra.mxu0 %v1395_v3  ;;  %1309 = vmatpush3.bf16.msra.mxu1 %v1395_v3  ;;  %v383_v11 = vld [vmem:[%s1525_s16 + $0x8] sm:$0xff]  ;;  %v382_v20 = vld [vmem:[%s1525_s16] sm:$0xff]  ;;  %v385_v26 = vld [vmem:[%s1525_s16 + $0x18] sm:$0xff]  ;;  %s1649_s8 = scalar_lea.vmem %s1746_s5, %s1202_s29  ;;  %s1663_s11 = scalar_lea.vmem %s1748_s7, %s1202_s29 }
  0x24   : > { %1246 = vmatprep.subr.bf16.mxu0 %v1396_v4  ;;  %1310 = vmatprep.subr.bf16.mxu1 %v1396_v4  ;;  %v407_v12 = vld [vmem:[%s1530_s19 + $0x8] sm:$0xff]  ;;  %v391_v13 = vunpack.c.l.s8.bf16 %v383_v11  ;;  %v406_v21 = vld [vmem:[%s1530_s19] sm:$0xff]  ;;  %v390_v22 = vunpack.c.l.s8.bf16 %v382_v20  ;;  %v393_v24 = vunpack.c.h.s8.bf16 %v383_v11  ;;  %v409_v27 = vld [vmem:[%s1530_s19 + $0x18] sm:$0xff]  ;;  %v392_v28 = vunpack.c.h.s8.bf16 %v382_v20 }
  0x25   : > { %v415_v14 = vunpack.c.l.s8.bf16 %v407_v12  ;;  %v414_v23 = vunpack.c.l.s8.bf16 %v406_v21  ;;  %v417_v25 = vunpack.c.h.s8.bf16 %v407_v12  ;;  %v416_v29 = vunpack.c.h.s8.bf16 %v406_v21  ;;  %v384_v32 = vld [vmem:[%s1525_s16 + $0x10] sm:$0xff]  ;;  %v387_v38 = vld [vmem:[%s1525_s16 + $0x28] sm:$0xff]  ;;  %v386_v44 = vld [vmem:[%s1525_s16 + $0x20] sm:$0xff] }
  0x26   : > { %564 = vmatprep.mubr.bf16.mxu0 %v391_v13  ;;  %v395_v30 = vunpack.c.l.s8.bf16 %v385_v26  ;;  %v419_v31 = vunpack.c.l.s8.bf16 %v409_v27  ;;  %v408_v33 = vld [vmem:[%s1530_s19 + $0x10] sm:$0xff]  ;;  %v394_v34 = vunpack.c.l.s8.bf16 %v384_v32  ;;  %v397_v36 = vunpack.c.h.s8.bf16 %v385_v26  ;;  %v411_v39 = vld [vmem:[%s1530_s19 + $0x28] sm:$0xff]  ;;  %v410_v45 = vld [vmem:[%s1530_s19 + $0x20] sm:$0xff] }
  0x27   : > { %1247 = vmatpush3.bf16.msra.mxu0 %v1397_v5  ;;  %1311 = vmatpush3.bf16.msra.mxu1 %v1397_v5  ;;  %v418_v35 = vunpack.c.l.s8.bf16 %v408_v33  ;;  %v421_v37 = vunpack.c.h.s8.bf16 %v409_v27  ;;  %v396_v40 = vunpack.c.h.s8.bf16 %v384_v32  ;;  %v420_v41 = vunpack.c.h.s8.bf16 %v408_v33  ;;  %v389_v50 = vld [vmem:[%s1525_s16 + $0x38] sm:$0xff]  ;;  %v388_v56 = vld [vmem:[%s1525_s16 + $0x30] sm:$0xff]  ;;  %v1551_v3 = vld [vmem:[%s1744_s3] ss:$0 sm:$0xff] }
  0x28   : > { %1248 = vmatprep.subr.bf16.mxu0 %v1398_v6  ;;  %1312 = vmatprep.subr.bf16.mxu1 %v1398_v6  ;;  %v399_v42 = vunpack.c.l.s8.bf16 %v387_v38  ;;  %v423_v43 = vunpack.c.l.s8.bf16 %v411_v39  ;;  %v398_v46 = vunpack.c.l.s8.bf16 %v386_v44  ;;  %v422_v47 = vunpack.c.l.s8.bf16 %v410_v45  ;;  %v413_v51 = vld [vmem:[%s1530_s19 + $0x38] sm:$0xff]  ;;  %v412_v57 = vld [vmem:[%s1530_s19 + $0x30] sm:$0xff] }
  0x29   : > { %661 = vmatprep.mubr.bf16.mxu1 %v415_v14  ;;  %v401_v48 = vunpack.c.h.s8.bf16 %v387_v38  ;;  %v425_v49 = vunpack.c.h.s8.bf16 %v411_v39  ;;  %v400_v52 = vunpack.c.h.s8.bf16 %v386_v44  ;;  %v424_v53 = vunpack.c.h.s8.bf16 %v410_v45 }
  0x2a   : > { %v403_v54 = vunpack.c.l.s8.bf16 %v389_v50  ;;  %v427_v55 = vunpack.c.l.s8.bf16 %v413_v51  ;;  %v402_v58 = vunpack.c.l.s8.bf16 %v388_v56  ;;  %v426_v59 = vunpack.c.l.s8.bf16 %v412_v57 }
  0x2b   : > { %1249 = vmatpush3.bf16.msra.mxu0 %v1399_v7  ;;  %1313 = vmatpush3.bf16.msra.mxu1 %v1399_v7  ;;  %v405_v60 = vunpack.c.h.s8.bf16 %v389_v50  ;;  %v429_v61 = vunpack.c.h.s8.bf16 %v413_v51  ;;  %v404_v62 = vunpack.c.h.s8.bf16 %v388_v56  ;;  %v428_v63 = vunpack.c.h.s8.bf16 %v412_v57 }
  0x2c   : > { %1250 = vmatprep.subr.bf16.mxu0 %v1400_v8  ;;  %1314 = vmatprep.subr.bf16.mxu1 %v1400_v8  ;;  %v794_v6 = vshrl.u32 %v793_v0, 7 }
  0x2f   : > { %1251 = vmatpush3.bf16.msra.mxu0 %v1401_v9  ;;  %1315 = vmatpush3.bf16.msra.mxu1 %v1401_v9  ;;  %v790_v9 = vld [vmem:[%s1745_s4] sm:$0x1] }
  0x30   : > { %1252 = vmatprep.subr.bf16.mxu0 %v1402_v10  ;;  %1316 = vmatprep.subr.bf16.mxu1 %v1402_v10  ;;  %v791_v10 = vld [vmem:[%s1745_s4 + $0x1] sm:$0x1] }
  0x33   : > { %1253 = vmatpush3.bf16.msra.mxu0 %v1403_v15  ;;  %1317 = vmatpush3.bf16.msra.mxu1 %v1403_v15 }
  0x34   : > { %1254 = vmatprep.subr.bf16.mxu0 %v1404_v16  ;;  %1318 = vmatprep.subr.bf16.mxu1 %v1404_v16 }
  0x37   : > { %1255 = vmatpush3.bf16.msra.mxu0 %v1405_v17  ;;  %1319 = vmatpush3.bf16.msra.mxu1 %v1405_v17  ;;  %v792_v17 = vsub.f32 %v790_v9, %v791_v10 }
  0x38   : > { %1256 = vmatprep.subr.bf16.mxu0 %v1406_v18  ;;  %1320 = vmatprep.subr.bf16.mxu1 %v1406_v18  ;;  %v795_v18 = vsub.s32 0, %v794_v6 }
  0x3a   : > { %v1565_v32 = vrot.slane %v790_v9, %v795_v18  ;;  %v1567_v33 = vrot.slane %v791_v10, %v795_v18 }
  0x3b   : > { %1257 = vmatpush3.bf16.msra.mxu0 %v1407_v19  ;;  %1321 = vmatpush3.bf16.msra.mxu1 %v1407_v19 }
  0x3e   : > { %565 = vmatmul.mubr.bf16.vlgmr.msra.gmra.mxu0 %v390_v22  ;;  %662 = vmatmul.mubr.bf16.vlgmr.msra.gmra.mxu1 %v414_v23 }
  0x3f   : > { %572 = vmatprep.mubr.bf16.mxu0 %v393_v24  ;;  %669 = vmatprep.mubr.bf16.mxu1 %v417_v25 }
  0x46   : > { %573 = vmatmul.mubr.bf16.gmra.mxu0 %v392_v28  ;;  %670 = vmatmul.mubr.bf16.gmra.mxu1 %v416_v29 }
  0x47   : > { %580 = vmatprep.mubr.bf16.mxu0 %v395_v30  ;;  %677 = vmatprep.mubr.bf16.mxu1 %v419_v31  ;;  %v1563_v31 = vrot.slane %v792_v17, %v795_v18 }
  0x4e   : > { %581 = vmatmul.mubr.bf16.gmra.mxu0 %v394_v34  ;;  %678 = vmatmul.mubr.bf16.gmra.mxu1 %v418_v35 }
  0x4f   : > { %588 = vmatprep.mubr.bf16.mxu0 %v397_v36  ;;  %685 = vmatprep.mubr.bf16.mxu1 %v421_v37 }
  0x56   : > { %589 = vmatmul.mubr.bf16.gmra.mxu0 %v396_v40  ;;  %686 = vmatmul.mubr.bf16.gmra.mxu1 %v420_v41 }
  0x57   : > { %596 = vmatprep.mubr.bf16.mxu0 %v399_v42  ;;  %693 = vmatprep.mubr.bf16.mxu1 %v423_v43 }
  0x5e   : > { %597 = vmatmul.mubr.bf16.gmra.mxu0 %v398_v46  ;;  %694 = vmatmul.mubr.bf16.gmra.mxu1 %v422_v47 }
  0x5f   : > { %604 = vmatprep.mubr.bf16.mxu0 %v401_v48  ;;  %701 = vmatprep.mubr.bf16.mxu1 %v425_v49 }
  0x66   : > { %605 = vmatmul.mubr.bf16.gmra.mxu0 %v400_v52  ;;  %702 = vmatmul.mubr.bf16.gmra.mxu1 %v424_v53 }
  0x67   : > { %612 = vmatprep.mubr.bf16.mxu0 %v403_v54  ;;  %709 = vmatprep.mubr.bf16.mxu1 %v427_v55 }
  0x6e   : > { %613 = vmatmul.mubr.bf16.gmra.mxu0 %v402_v58  ;;  %710 = vmatmul.mubr.bf16.gmra.mxu1 %v426_v59 }
  0x6f   : > { %620 = vmatprep.mubr.bf16.mxu0 %v405_v60  ;;  %717 = vmatprep.mubr.bf16.mxu1 %v429_v61 }
  0x76   : > { %621 = vmatmul.mubr.bf16.gmra.mxu0 %v404_v62  ;;  %718 = vmatmul.mubr.bf16.gmra.mxu1 %v428_v63 }
  0xfe   : > { %v1258_v1 = vpop.f32.mrf.mxu0  ;;  %v1322_v2 = vpop.f32.mrf.mxu1 }
 0x100   : > { %v1259_v4 = vpop.f32.mrf.mxu0  ;;  %v1323_v5 = vpop.f32.mrf.mxu1 }
 0x101   : > { %v1260_v7 = vadd.f32 %v1259_v4, %v1258_v1  ;;  %v1324_v8 = vadd.f32 %v1323_v5, %v1322_v2 }
 0x102   : > { %v1261_v11 = vpop.f32.mrf.mxu0  ;;  %v1325_v12 = vpop.f32.mrf.mxu1 }
 0x103   : > { %v567_v13 = vadd.f32 %v1260_v7, %v1551_v3  ;;  %v664_v14 = vadd.f32 %v1324_v8, %v1551_v3 }
 0x104   : > { %v1262_v15 = vpop.f32.mrf.mxu0  ;;  %v1326_v16 = vpop.f32.mrf.mxu1 }
 0x105   : > { %v726_v19 = vmax.f32 %v567_v13, 0.0  ;;  %v758_v20 = vmax.f32 %v664_v14, 0.0  ;;  %v1263_v21 = vadd.f32 %v1262_v15, %v1261_v11  ;;  %v1327_v22 = vadd.f32 %v1326_v16, %v1325_v12 }
 0x106   : > { %v1264_v23 = vpop.f32.mrf.mxu0  ;;  %v1328_v24 = vpop.f32.mrf.mxu1 }
 0x107   : > { %v742_v25 = vmin.f32 %v726_v19, 255.0  ;;  %v774_v26 = vmin.f32 %v758_v20, 255.0  ;;  %v570_v27 = vadd.f32 %v1263_v21, %v1551_v3  ;;  %v667_v28 = vadd.f32 %v1327_v22, %v1551_v3 }
 0x108   : > { %v1265_v29 = vpop.f32.mrf.mxu0  ;;  %v1329_v30 = vpop.f32.mrf.mxu1 }
 0x109   : > { %v727_v34 = vmax.f32 %v570_v27, 0.0  ;;  %v759_v35 = vmax.f32 %v667_v28, 0.0  ;;  %v1266_v36 = vadd.f32 %v1265_v29, %v1264_v23  ;;  %v1330_v37 = vadd.f32 %v1329_v30, %v1328_v24 }
 0x10a   : > { %v1267_v38 = vpop.f32.mrf.mxu0  ;;  %v1331_v39 = vpop.f32.mrf.mxu1  ;;  %v881_v40 = vsub.f32 %v774_v26, %v742_v25  ;;  %v797_v48 = vmul.f32 %v1565_v32, %v742_v25  ;;  %v817_v49 = vmul.f32 %v1567_v33, %v774_v26 }
 0x10b   : > { %v743_v41 = vmin.f32 %v727_v34, 255.0  ;;  %v775_v42 = vmin.f32 %v759_v35, 255.0  ;;  %v575_v43 = vadd.f32 %v1266_v36, %v1551_v3  ;;  %v672_v44 = vadd.f32 %v1330_v37, %v1551_v3 }
 0x10c   : > { %v1268_v45 = vpop.f32.mrf.mxu0  ;;  %v1332_v46 = vpop.f32.mrf.mxu1  ;;  %v901_v47 = vmul.f32 %v1563_v31, %v881_v40  ;;  %v833_v1 = vadd.f32 %v817_v49, %v797_v48 }
 0x10d   : > { %v728_v50 = vmax.f32 %v575_v43, 0.0  ;;  %v760_v51 = vmax.f32 %v672_v44, 0.0  ;;  %v1269_v52 = vadd.f32 %v1268_v45, %v1267_v38  ;;  %v1333_v53 = vadd.f32 %v1332_v46, %v1331_v39 }
 0x10e   : > { %917 = vadd.xlane.f32.xlu0 %v901_v47  ;;  %v1270_v54 = vpop.f32.mrf.mxu0  ;;  %v1334_v55 = vpop.f32.mrf.mxu1  ;;  %v798_v56 = vmul.f32 %v1565_v32, %v743_v41  ;;  %v818_v57 = vmul.f32 %v1567_v33, %v775_v42  ;;  %v882_v2 = vsub.f32 %v775_v42, %v743_v41 }
 0x10f   : > { %v744_v58 = vmin.f32 %v728_v50, 255.0  ;;  %v776_v59 = vmin.f32 %v760_v51, 255.0  ;;  %v578_v60 = vadd.f32 %v1269_v52, %v1551_v3  ;;  %v675_v61 = vadd.f32 %v1333_v53, %v1551_v3 }
 0x110   : > { %v1271_v62 = vpop.f32.mrf.mxu0  ;;  %v1335_v63 = vpop.f32.mrf.mxu1  ;;  %v834_v0 = vadd.f32 %v818_v57, %v798_v56  ;;  %v902_v18 = vmul.f32 %v1563_v31, %v882_v2 }
 0x111   : > { %v729_v4 = vmax.f32 %v578_v60, 0.0  ;;  %v761_v5 = vmax.f32 %v675_v61, 0.0  ;;  %v1272_v6 = vadd.f32 %v1271_v62, %v1270_v54  ;;  %v1336_v7 = vadd.f32 %v1335_v63, %v1334_v55 }
 0x112   : > { %851 = vadd.xlane.f32.xlu1 %v834_v0  ;;  %849 = vadd.xlane.f32.xlu0 %v833_v1  ;;  %v1273_v8 = vpop.f32.mrf.mxu0  ;;  %v1337_v9 = vpop.f32.mrf.mxu1  ;;  %v883_v10 = vsub.f32 %v776_v59, %v744_v58  ;;  %v799_v19 = vmul.f32 %v1565_v32, %v744_v58  ;;  %v819_v20 = vmul.f32 %v1567_v33, %v776_v59 }
 0x113   : > { %v745_v11 = vmin.f32 %v729_v4, 255.0  ;;  %v777_v12 = vmin.f32 %v761_v5, 255.0  ;;  %v583_v13 = vadd.f32 %v1272_v6, %v1551_v3  ;;  %v680_v14 = vadd.f32 %v1336_v7, %v1551_v3 }
 0x114   : > { %v1274_v15 = vpop.f32.mrf.mxu0  ;;  %v1338_v16 = vpop.f32.mrf.mxu1  ;;  %v903_v17 = vmul.f32 %v1563_v31, %v883_v10  ;;  %v835_v38 = vadd.f32 %v819_v20, %v799_v19 }
 0x115   : > { %v730_v21 = vmax.f32 %v583_v13, 0.0  ;;  %v762_v22 = vmax.f32 %v680_v14, 0.0  ;;  %v1275_v23 = vadd.f32 %v1274_v15, %v1273_v8  ;;  %v1339_v24 = vadd.f32 %v1338_v16, %v1337_v9 }
 0x116   : > { %921 = vadd.xlane.f32.xlu1 %v903_v17  ;;  %919 = vadd.xlane.f32.xlu0 %v902_v18  ;;  %v1276_v25 = vpop.f32.mrf.mxu0  ;;  %v1340_v26 = vpop.f32.mrf.mxu1  ;;  %v884_v27 = vsub.f32 %v777_v12, %v745_v11  ;;  %v800_v39 = vmul.f32 %v1565_v32, %v745_v11  ;;  %v820_v40 = vmul.f32 %v1567_v33, %v777_v12 }
 0x117   : > { %v746_v28 = vmin.f32 %v730_v21, 255.0  ;;  %v778_v29 = vmin.f32 %v762_v22, 255.0  ;;  %v586_v30 = vadd.f32 %v1275_v23, %v1551_v3  ;;  %v683_v34 = vadd.f32 %v1339_v24, %v1551_v3 }
 0x118   : > { %v1277_v35 = vpop.f32.mrf.mxu0  ;;  %v1341_v36 = vpop.f32.mrf.mxu1  ;;  %v904_v37 = vmul.f32 %v1563_v31, %v884_v27  ;;  %v836_v54 = vadd.f32 %v820_v40, %v800_v39 }
 0x119   : > { %v731_v41 = vmax.f32 %v586_v30, 0.0  ;;  %v763_v42 = vmax.f32 %v683_v34, 0.0  ;;  %v1278_v43 = vadd.f32 %v1277_v35, %v1276_v25  ;;  %v1342_v44 = vadd.f32 %v1341_v36, %v1340_v26 }
 0x11a   : > { %923 = vadd.xlane.f32.xlu1 %v904_v37  ;;  %853 = vadd.xlane.f32.xlu0 %v835_v38  ;;  %v1279_v45 = vpop.f32.mrf.mxu0  ;;  %v1343_v46 = vpop.f32.mrf.mxu1  ;;  %v885_v47 = vsub.f32 %v778_v29, %v746_v28  ;;  %v801_v56 = vmul.f32 %v1565_v32, %v746_v28  ;;  %v821_v57 = vmul.f32 %v1567_v33, %v778_v29 }
 0x11b   : > { %v747_v48 = vmin.f32 %v731_v41, 255.0  ;;  %v779_v49 = vmin.f32 %v763_v42, 255.0  ;;  %v591_v50 = vadd.f32 %v1278_v43, %v1551_v3  ;;  %v688_v51 = vadd.f32 %v1342_v44, %v1551_v3 }
 0x11c   : > { %v1280_v52 = vpop.f32.mrf.mxu0  ;;  %v1344_v53 = vpop.f32.mrf.mxu1  ;;  %v905_v55 = vmul.f32 %v1563_v31, %v885_v47  ;;  %v837_v9 = vadd.f32 %v821_v57, %v801_v56 }
 0x11d   : > { %v732_v58 = vmax.f32 %v591_v50, 0.0  ;;  %v764_v59 = vmax.f32 %v688_v51, 0.0  ;;  %v1281_v60 = vadd.f32 %v1280_v52, %v1279_v45  ;;  %v1345_v61 = vadd.f32 %v1344_v53, %v1343_v46 }
 0x11e   : > { %855 = vadd.xlane.f32.xlu1 %v836_v54  ;;  %925 = vadd.xlane.f32.xlu0 %v905_v55  ;;  %v1282_v62 = vpop.f32.mrf.mxu0  ;;  %v1346_v63 = vpop.f32.mrf.mxu1  ;;  %v886_v0 = vsub.f32 %v779_v49, %v747_v48  ;;  %v802_v10 = vmul.f32 %v1565_v32, %v747_v48  ;;  %v822_v11 = vmul.f32 %v1567_v33, %v779_v49 }
 0x11f   : > { %v748_v1 = vmin.f32 %v732_v58, 255.0  ;;  %v780_v2 = vmin.f32 %v764_v59, 255.0  ;;  %v594_v4 = vadd.f32 %v1281_v60, %v1551_v3  ;;  %v691_v5 = vadd.f32 %v1345_v61, %v1551_v3 }
 0x120   : > { %v1283_v6 = vpop.f32.mrf.mxu0  ;;  %v1347_v7 = vpop.f32.mrf.mxu1  ;;  %v906_v8 = vmul.f32 %v1563_v31, %v886_v0  ;;  %v838_v25 = vadd.f32 %v822_v11, %v802_v10 }
 0x121   : > { %v733_v12 = vmax.f32 %v594_v4, 0.0  ;;  %v765_v13 = vmax.f32 %v691_v5, 0.0  ;;  %v1284_v14 = vadd.f32 %v1283_v6, %v1282_v62  ;;  %v1348_v15 = vadd.f32 %v1347_v7, %v1346_v63 }
 0x122   : > { %927 = vadd.xlane.f32.xlu1 %v906_v8  ;;  %857 = vadd.xlane.f32.xlu0 %v837_v9  ;;  %v1285_v16 = vpop.f32.mrf.mxu0  ;;  %v1349_v17 = vpop.f32.mrf.mxu1  ;;  %v887_v18 = vsub.f32 %v780_v2, %v748_v1  ;;  %v803_v27 = vmul.f32 %v1565_v32, %v748_v1  ;;  %v823_v28 = vmul.f32 %v1567_v33, %v780_v2 }
 0x123   : > { %v749_v19 = vmin.f32 %v733_v12, 255.0  ;;  %v781_v20 = vmin.f32 %v765_v13, 255.0  ;;  %v599_v21 = vadd.f32 %v1284_v14, %v1551_v3  ;;  %v696_v22 = vadd.f32 %v1348_v15, %v1551_v3 }
 0x124   : > { %v1286_v23 = vpop.f32.mrf.mxu0  ;;  %v1350_v24 = vpop.f32.mrf.mxu1  ;;  %v907_v26 = vmul.f32 %v1563_v31, %v887_v18  ;;  %v839_v46 = vadd.f32 %v823_v28, %v803_v27 }
 0x125   : > { %v734_v29 = vmax.f32 %v599_v21, 0.0  ;;  %v766_v30 = vmax.f32 %v696_v22, 0.0  ;;  %v1287_v34 = vadd.f32 %v1286_v23, %v1285_v16  ;;  %v1351_v35 = vadd.f32 %v1350_v24, %v1349_v17 }
 0x126   : > { %859 = vadd.xlane.f32.xlu1 %v838_v25  ;;  %929 = vadd.xlane.f32.xlu0 %v907_v26  ;;  %v1288_v36 = vpop.f32.mrf.mxu0  ;;  %v1352_v37 = vpop.f32.mrf.mxu1  ;;  %v888_v38 = vsub.f32 %v781_v20, %v749_v19  ;;  %v804_v47 = vmul.f32 %v1565_v32, %v749_v19  ;;  %v824_v48 = vmul.f32 %v1567_v33, %v781_v20 }
 0x127   : > { %v750_v39 = vmin.f32 %v734_v29, 255.0  ;;  %v782_v40 = vmin.f32 %v766_v30, 255.0  ;;  %v602_v41 = vadd.f32 %v1287_v34, %v1551_v3  ;;  %v699_v42 = vadd.f32 %v1351_v35, %v1551_v3 }
 0x128   : > { %v1289_v43 = vpop.f32.mrf.mxu0  ;;  %v1353_v44 = vpop.f32.mrf.mxu1  ;;  %v908_v45 = vmul.f32 %v1563_v31, %v888_v38  ;;  %v840_v62 = vadd.f32 %v824_v48, %v804_v47 }
 0x129   : > { %v735_v49 = vmax.f32 %v602_v41, 0.0  ;;  %v767_v50 = vmax.f32 %v699_v42, 0.0  ;;  %v1290_v51 = vadd.f32 %v1289_v43, %v1288_v36  ;;  %v1354_v52 = vadd.f32 %v1353_v44, %v1352_v37 }
 0x12a   : > { %931 = vadd.xlane.f32.xlu1 %v908_v45  ;;  %861 = vadd.xlane.f32.xlu0 %v839_v46  ;;  %v1291_v53 = vpop.f32.mrf.mxu0  ;;  %v1355_v54 = vpop.f32.mrf.mxu1  ;;  %v889_v55 = vsub.f32 %v782_v40, %v750_v39  ;;  %v805_v0 = vmul.f32 %v1565_v32, %v750_v39  ;;  %v825_v1 = vmul.f32 %v1567_v33, %v782_v40 }
 0x12b   : > { %v751_v56 = vmin.f32 %v735_v49, 255.0  ;;  %v783_v57 = vmin.f32 %v767_v50, 255.0  ;;  %v607_v58 = vadd.f32 %v1290_v51, %v1551_v3  ;;  %v704_v59 = vadd.f32 %v1354_v52, %v1551_v3 }
 0x12c   : > { %v1292_v60 = vpop.f32.mrf.mxu0  ;;  %v1356_v61 = vpop.f32.mrf.mxu1  ;;  %v909_v63 = vmul.f32 %v1563_v31, %v889_v55  ;;  %v841_v17 = vadd.f32 %v825_v1, %v805_v0 }
 0x12d   : > { %v736_v2 = vmax.f32 %v607_v58, 0.0  ;;  %v768_v4 = vmax.f32 %v704_v59, 0.0  ;;  %v1293_v5 = vadd.f32 %v1292_v60, %v1291_v53  ;;  %v1357_v6 = vadd.f32 %v1356_v61, %v1355_v54 }
 0x12e   : > { %863 = vadd.xlane.f32.xlu1 %v840_v62  ;;  %933 = vadd.xlane.f32.xlu0 %v909_v63  ;;  %v1294_v7 = vpop.f32.mrf.mxu0  ;;  %v1358_v8 = vpop.f32.mrf.mxu1  ;;  %v890_v9 = vsub.f32 %v783_v57, %v751_v56  ;;  %v806_v18 = vmul.f32 %v1565_v32, %v751_v56  ;;  %v826_v19 = vmul.f32 %v1567_v33, %v783_v57 }
 0x12f   : > { %v752_v10 = vmin.f32 %v736_v2, 255.0  ;;  %v784_v11 = vmin.f32 %v768_v4, 255.0  ;;  %v610_v12 = vadd.f32 %v1293_v5, %v1551_v3  ;;  %v707_v13 = vadd.f32 %v1357_v6, %v1551_v3 }
 0x130   : > { %v1295_v14 = vpop.f32.mrf.mxu0  ;;  %v1359_v15 = vpop.f32.mrf.mxu1  ;;  %v910_v16 = vmul.f32 %v1563_v31, %v890_v9  ;;  %v842_v36 = vadd.f32 %v826_v19, %v806_v18 }
 0x131   : > { %v737_v20 = vmax.f32 %v610_v12, 0.0  ;;  %v769_v21 = vmax.f32 %v707_v13, 0.0  ;;  %v1296_v22 = vadd.f32 %v1295_v14, %v1294_v7  ;;  %v1360_v23 = vadd.f32 %v1359_v15, %v1358_v8 }
 0x132   : > { %935 = vadd.xlane.f32.xlu1 %v910_v16  ;;  %865 = vadd.xlane.f32.xlu0 %v841_v17  ;;  %v1297_v24 = vpop.f32.mrf.mxu0  ;;  %v1361_v25 = vpop.f32.mrf.mxu1  ;;  %v891_v26 = vsub.f32 %v784_v11, %v752_v10  ;;  %v807_v38 = vmul.f32 %v1565_v32, %v752_v10  ;;  %v827_v39 = vmul.f32 %v1567_v33, %v784_v11 }
 0x133   : > { %v753_v27 = vmin.f32 %v737_v20, 255.0  ;;  %v785_v28 = vmin.f32 %v769_v21, 255.0  ;;  %v615_v29 = vadd.f32 %v1296_v22, %v1551_v3  ;;  %v712_v30 = vadd.f32 %v1360_v23, %v1551_v3 }
 0x134   : > { %v1298_v34 = vpop.f32.mrf.mxu0  ;;  %v1362_v35 = vpop.f32.mrf.mxu1  ;;  %v911_v37 = vmul.f32 %v1563_v31, %v891_v26  ;;  %v843_v54 = vadd.f32 %v827_v39, %v807_v38 }
 0x135   : > { %v738_v40 = vmax.f32 %v615_v29, 0.0  ;;  %v770_v41 = vmax.f32 %v712_v30, 0.0  ;;  %v1299_v42 = vadd.f32 %v1298_v34, %v1297_v24  ;;  %v1363_v43 = vadd.f32 %v1362_v35, %v1361_v25 }
 0x136   : > { %867 = vadd.xlane.f32.xlu1 %v842_v36  ;;  %937 = vadd.xlane.f32.xlu0 %v911_v37  ;;  %v1300_v44 = vpop.f32.mrf.mxu0  ;;  %v1364_v45 = vpop.f32.mrf.mxu1  ;;  %v892_v46 = vsub.f32 %v785_v28, %v753_v27  ;;  %v808_v55 = vmul.f32 %v1565_v32, %v753_v27  ;;  %v828_v56 = vmul.f32 %v1567_v33, %v785_v28 }
 0x137   : > { %v754_v47 = vmin.f32 %v738_v40, 255.0  ;;  %v786_v48 = vmin.f32 %v770_v41, 255.0  ;;  %v618_v49 = vadd.f32 %v1299_v42, %v1551_v3  ;;  %v715_v50 = vadd.f32 %v1363_v43, %v1551_v3  ;;  %v950_v42 = vld [vmem:[%s1649_s8 + $0x8] sm:$0xff]  ;;  %v951_v43 = vld [vmem:[%s1649_s8 + $0x10] sm:$0xff] }
 0x138   : > { %v1301_v51 = vpop.f32.mrf.mxu0  ;;  %v1365_v52 = vpop.f32.mrf.mxu1  ;;  %v912_v53 = vmul.f32 %v1563_v31, %v892_v46  ;;  %v844_v7 = vadd.f32 %v828_v56, %v808_v55  ;;  %vm966_vm1 = vcmp.ne.f32.partialorder %v950_v42, 0.0  ;;  %v1655_v46 = vstv %s1045_s9 }
 0x139   : > { %v739_v57 = vmax.f32 %v618_v49, 0.0  ;;  %v771_v58 = vmax.f32 %v715_v50, 0.0  ;;  %v1302_v59 = vadd.f32 %v1301_v51, %v1300_v44  ;;  %v1366_v60 = vadd.f32 %v1365_v52, %v1364_v45  ;;  %v952_v50 = vld [vmem:[%s1649_s8 + $0x18] sm:$0xff] }
 0x13a   : > { %939 = vadd.xlane.f32.xlu1 %v912_v53  ;;  %869 = vadd.xlane.f32.xlu0 %v843_v54  ;;  %v1303_v61 = vpop.f32.mrf.mxu0  ;;  %v1367_v62 = vpop.f32.mrf.mxu1  ;;  %v893_v63 = vsub.f32 %v786_v48, %v754_v47  ;;  %v809_v9 = vmul.f32 %v1565_v32, %v754_v47  ;;  %v829_v10 = vmul.f32 %v1567_v33, %v786_v48  ;;  %vm967_vm2 = vcmp.ne.f32.partialorder %v951_v43, 0.0  ;;  %v959_v43 = vld [vmem:[%s1649_s8 + $0x50] sm:$0xff] }
 0x13b   : > { %v755_v0 = vmin.f32 %v739_v57, 255.0  ;;  %v787_v1 = vmin.f32 %v771_v58, 255.0  ;;  %v623_v2 = vadd.f32 %v1302_v59, %v1551_v3  ;;  %v720_v4 = vadd.f32 %v1366_v60, %v1551_v3  ;;  %v953_v57 = vld [vmem:[%s1649_s8 + $0x20] sm:$0xff] }
 0x13c   : > { %v1304_v5 = vpop.f32.mrf.mxu0  ;;  %v1368_v6 = vpop.f32.mrf.mxu1  ;;  %v913_v8 = vmul.f32 %v1563_v31, %v893_v63  ;;  %v845_v21 = vadd.f32 %v829_v10, %v809_v9  ;;  %vm968_vm4 = vcmp.ne.f32.partialorder %v952_v50, 0.0  ;;  %vm969_vm5 = vcmp.ne.f32.partialorder %v953_v57, 0.0 }
 0x13d   : > { %v740_v11 = vmax.f32 %v623_v2, 0.0  ;;  %v772_v12 = vmax.f32 %v720_v4, 0.0  ;;  %v1305_v13 = vadd.f32 %v1304_v5, %v1303_v61  ;;  %v1369_v14 = vadd.f32 %v1368_v6, %v1367_v62 }
 0x13e   : > { %871 = vadd.xlane.f32.xlu1 %v844_v7  ;;  %941 = vadd.xlane.f32.xlu0 %v913_v8  ;;  %v894_v15 = vsub.f32 %v787_v1, %v755_v0  ;;  %v810_v22 = vmul.f32 %v1565_v32, %v755_v0  ;;  %v830_v23 = vmul.f32 %v1567_v33, %v787_v1  ;;  %v954_v1 = vld [vmem:[%s1649_s8 + $0x28] sm:$0xff]  ;;  %vm975_vm11 = vcmp.ne.f32.partialorder %v959_v43, 0.0 }
 0x13f   : > { %v756_v16 = vmin.f32 %v740_v11, 255.0  ;;  %v788_v17 = vmin.f32 %v772_v12, 255.0  ;;  %v626_v18 = vadd.f32 %v1305_v13, %v1551_v3  ;;  %v723_v19 = vadd.f32 %v1369_v14, %v1551_v3  ;;  %v955_v11 = vld [vmem:[%s1649_s8 + $0x30] sm:$0xff] }
 0x140   : > { %v914_v20 = vmul.f32 %v1563_v31, %v894_v15  ;;  %v846_v30 = vadd.f32 %v830_v23, %v810_v22  ;;  %vm970_vm6 = vcmp.ne.f32.partialorder %v954_v1, 0.0  ;;  %vm971_vm7 = vcmp.ne.f32.partialorder %v955_v11, 0.0 }
 0x141   : > { %v741_v24 = vmax.f32 %v626_v18, 0.0  ;;  %v773_v25 = vmax.f32 %v723_v19, 0.0  ;;  %v895_v26 = vsub.f32 %v788_v17, %v756_v16  ;;  %v811_v3 = vmul.f32 %v1565_v32, %v756_v16  ;;  %v956_v19 = vld [vmem:[%s1649_s8 + $0x38] sm:$0xff] }
 0x142   : > { %943 = vadd.xlane.f32.xlu1 %v914_v20  ;;  %873 = vadd.xlane.f32.xlu0 %v845_v21  ;;  %v831_v34 = vmul.f32 %v1567_v33, %v788_v17  ;;  %vm972_vm8 = vcmp.ne.f32.partialorder %v956_v19, 0.0 }
 0x143   : > { %v757_v27 = vmin.f32 %v741_v24, 255.0  ;;  %v789_v28 = vmin.f32 %v773_v25, 255.0  ;;  %v915_v29 = vmul.f32 %v1563_v31, %v895_v26 }
 0x144   : > { %v847_v37 = vadd.f32 %v831_v34, %v811_v3 }
 0x145   : > { %v896_v35 = vsub.f32 %v789_v28, %v757_v27  ;;  %v812_v38 = vmul.f32 %v1565_v32, %v757_v27  ;;  %v832_v39 = vmul.f32 %v1567_v33, %v789_v28  ;;  %v1449_v32 = vmov 0.0   ;;  %v957_v27 = vld [vmem:[%s1649_s8 + $0x40] sm:$0xff] }
 0x146   : > { %875 = vadd.xlane.f32.xlu1 %v846_v30  ;;  %945 = vadd.xlane.f32.xlu0 %v915_v29  ;;  %v1223_v49 = vsel %vm966_vm1, 1.0, %v1449_v32  ;;  %v1224_v52 = vsel %vm967_vm2, 1.0, %v1449_v32  ;;  %v1225_v60 = vsel %vm968_vm4, 1.0, %v1449_v32  ;;  %v1226_v7 = vsel %vm969_vm5, 1.0, %v1449_v32 }
 0x147   : > { %v916_v36 = vmul.f32 %v1563_v31, %v896_v35  ;;  %v848_v40 = vadd.f32 %v832_v39, %v812_v38  ;;  %v949_v31 = vld [vmem:[%s1649_s8] sm:$0xff]  ;;  %v1227_v14 = vsel %vm970_vm6, 1.0, %v1449_v32  ;;  %v1228_v23 = vsel %vm971_vm7, 1.0, %v1449_v32 }
 0x148   : > { %vm965_vm0 = vcmp.ne.f32.partialorder %v949_v31, 0.0  ;;  %v1229_v30 = vsel %vm972_vm8, 1.0, %v1449_v32  ;;  %vm973_vm9 = vcmp.ne.f32.partialorder %v957_v27, 0.0 }
 0x149   : > { %v1222_v33 = vsel %vm965_vm0, 1.0, %v1449_v32  ;;  %v1230_v31 = vsel %vm973_vm9, 1.0, %v1449_v32 }
 0x14a   : > { %947 = vadd.xlane.f32.xlu1 %v916_v36  ;;  %877 = vadd.xlane.f32.xlu0 %v847_v37  ;;  %v958_v37 = vld [vmem:[%s1649_s8 + $0x48] sm:$0xff] }
 0x14b   : > { %vm974_vm10 = vcmp.ne.f32.partialorder %v958_v37, 0.0 }
 0x14e   : > { %879 = vadd.xlane.f32.xlu1 %v848_v40 }
 0x197   : > { %v918_v41 = vpop.xlane.xlu0 %917 }
 0x198   : > { %v1013_v44 = vmul.f32 %v1222_v33, %v918_v41 }
 0x19b   : > { %v852_v45 = vpop.xlane.xlu1 %851  ;;  %v850_v47 = vpop.xlane.xlu0 %849 }
 0x19c   : > { %v1029_v48 = vadd.f32 %v1013_v44, %v850_v47  ;;  %v1231_v47 = vsel %vm974_vm10, 1.0, %v1449_v32 }
 0x19e   : > { %v1047_v51 = vadd.f32 %v1655_v46, %v1029_v48 }
 0x19f   : > { %v922_v53 = vpop.xlane.xlu1 %921  ;;  %v920_v54 = vpop.xlane.xlu0 %919 }
 0x1a0   : > { %v1063_v55 = vmul.f32 0.024509804, %v1047_v51  ;;  %v1014_v56 = vmul.f32 %v1223_v49, %v920_v54  ;;  %v1015_v58 = vmul.f32 %v1224_v52, %v922_v53  ;;  %v960_v52 = vld [vmem:[%s1649_s8 + $0x58] sm:$0xff] }
 0x1a1   : > { %vm976_vm12 = vcmp.ne.f32.partialorder %v960_v52, 0.0 }
 0x1a2   : > { %1080 = vst.msk [vmem:[%s1663_s11] sm:$0xff] %vm1079_vm3, %v1063_v55  ;;  %v1030_v59 = vadd.f32 %v1014_v56, %v852_v45  ;;  %v1232_v56 = vsel %vm975_vm11, 1.0, %v1449_v32 }
 0x1a3   : > { %v924_v61 = vpop.xlane.xlu1 %923  ;;  %v854_v62 = vpop.xlane.xlu0 %853 }
 0x1a4   : > { %v1048_v63 = vadd.f32 %v1655_v46, %v1030_v59  ;;  %v1031_v0 = vadd.f32 %v1015_v58, %v854_v62  ;;  %v1016_v4 = vmul.f32 %v1225_v60, %v924_v61  ;;  %v961_v60 = vld [vmem:[%s1649_s8 + $0x60] sm:$0xff] }
 0x1a5   : > { %vm977_vm13 = vcmp.ne.f32.partialorder %v961_v60, 0.0 }
 0x1a6   : > { %v1064_v2 = vmul.f32 0.024509804, %v1048_v63  ;;  %v1049_v5 = vadd.f32 %v1655_v46, %v1031_v0  ;;  %v1233_v63 = vsel %vm976_vm12, 1.0, %v1449_v32 }
 0x1a7   : > { %v856_v6 = vpop.xlane.xlu1 %855  ;;  %v926_v8 = vpop.xlane.xlu0 %925 }
 0x1a8   : > { %1081 = vst.msk [vmem:[%s1663_s11 + $0x8] sm:$0xff] %vm1079_vm3, %v1064_v2  ;;  %v1065_v9 = vmul.f32 0.024509804, %v1049_v5  ;;  %v1032_v10 = vadd.f32 %v1016_v4, %v856_v6  ;;  %v1017_v13 = vmul.f32 %v1226_v7, %v926_v8  ;;  %v962_v5 = vld [vmem:[%s1649_s8 + $0x68] sm:$0xff] }
 0x1a9   : > { %vm978_vm14 = vcmp.ne.f32.partialorder %v962_v5, 0.0 }
 0x1aa   : > { %1082 = vst.msk [vmem:[%s1663_s11 + $0x10] sm:$0xff] %vm1079_vm3, %v1065_v9  ;;  %v1050_v12 = vadd.f32 %v1655_v46, %v1032_v10  ;;  %v1234_v9 = vsel %vm977_vm13, 1.0, %v1449_v32 }
 0x1ab   : > { %v928_v15 = vpop.xlane.xlu1 %927  ;;  %v858_v16 = vpop.xlane.xlu0 %857 }
 0x1ac   : > { %v1066_v17 = vmul.f32 0.024509804, %v1050_v12  ;;  %v1033_v18 = vadd.f32 %v1017_v13, %v858_v16  ;;  %v1018_v20 = vmul.f32 %v1227_v14, %v928_v15  ;;  %v963_v13 = vld [vmem:[%s1649_s8 + $0x70] sm:$0xff]  ;;  %v1235_v16 = vsel %vm978_vm14, 1.0, %v1449_v32 }
 0x1ad   : > { %vm979_vm15 = vcmp.ne.f32.partialorder %v963_v13, 0.0 }
 0x1ae   : > { %1083 = vst.msk [vmem:[%s1663_s11 + $0x18] sm:$0xff] %vm1079_vm3, %v1066_v17  ;;  %v1051_v21 = vadd.f32 %v1655_v46, %v1033_v18 }
 0x1af   : > { %v860_v22 = vpop.xlane.xlu1 %859  ;;  %v930_v24 = vpop.xlane.xlu0 %929 }
 0x1b0   : > { %v1067_v25 = vmul.f32 0.024509804, %v1051_v21  ;;  %v1034_v26 = vadd.f32 %v1018_v20, %v860_v22  ;;  %v1019_v29 = vmul.f32 %v1228_v23, %v930_v24  ;;  %v964_v21 = vld [vmem:[%s1649_s8 + $0x78] sm:$0xff] }
 0x1b1   : > { %vm980_vm0 = vcmp.ne.f32.partialorder %v964_v21, 0.0 }
 0x1b2   : > { %1084 = vst.msk [vmem:[%s1663_s11 + $0x20] sm:$0xff] %vm1079_vm3, %v1067_v25  ;;  %v1052_v28 = vadd.f32 %v1655_v46, %v1034_v26  ;;  %v1236_v25 = vsel %vm979_vm15, 1.0, %v1449_v32 }
 0x1b3   : > { %v932_v3 = vpop.xlane.xlu1 %931  ;;  %v862_v34 = vpop.xlane.xlu0 %861 }
 0x1b4   : > { %v1068_v35 = vmul.f32 0.024509804, %v1052_v28  ;;  %v1035_v36 = vadd.f32 %v1019_v29, %v862_v34  ;;  %v1020_v38 = vmul.f32 %v1229_v30, %v932_v3  ;;  %v1237_v3 = vsel %vm980_vm0, 1.0, %v1449_v32 }
 0x1b6   : > { %1085 = vst.msk [vmem:[%s1663_s11 + $0x28] sm:$0xff] %vm1079_vm3, %v1068_v35  ;;  %v1053_v39 = vadd.f32 %v1655_v46, %v1035_v36 }
 0x1b7   : > { %v864_v40 = vpop.xlane.xlu1 %863  ;;  %v934_v33 = vpop.xlane.xlu0 %933 }
 0x1b8   : > { %v1069_v41 = vmul.f32 0.024509804, %v1053_v39  ;;  %v1036_v42 = vadd.f32 %v1020_v38, %v864_v40  ;;  %v1021_v45 = vmul.f32 %v1230_v31, %v934_v33 }
 0x1ba   : > { %1086 = vst.msk [vmem:[%s1663_s11 + $0x30] sm:$0xff] %vm1079_vm3, %v1069_v41  ;;  %v1054_v44 = vadd.f32 %v1655_v46, %v1036_v42 }
 0x1bb   : > { %v936_v48 = vpop.xlane.xlu1 %935  ;;  %v866_v49 = vpop.xlane.xlu0 %865 }
 0x1bc   : > { %v1070_v50 = vmul.f32 0.024509804, %v1054_v44  ;;  %v1037_v51 = vadd.f32 %v1021_v45, %v866_v49  ;;  %v1022_v53 = vmul.f32 %v1231_v47, %v936_v48 }
 0x1be   : > { %1087 = vst.msk [vmem:[%s1663_s11 + $0x38] sm:$0xff] %vm1079_vm3, %v1070_v50  ;;  %v1055_v54 = vadd.f32 %v1655_v46, %v1037_v51 }
 0x1bf   : > { %v868_v55 = vpop.xlane.xlu1 %867  ;;  %v938_v57 = vpop.xlane.xlu0 %937 }
 0x1c0   : > { %v1071_v58 = vmul.f32 0.024509804, %v1055_v54  ;;  %v1038_v59 = vadd.f32 %v1022_v53, %v868_v55  ;;  %v1023_v62 = vmul.f32 %v1232_v56, %v938_v57 }
 0x1c2   : > { %1088 = vst.msk [vmem:[%s1663_s11 + $0x40] sm:$0xff] %vm1079_vm3, %v1071_v58  ;;  %v1056_v61 = vadd.f32 %v1655_v46, %v1038_v59 }
 0x1c3   : > { %v940_v0 = vpop.xlane.xlu1 %939  ;;  %v870_v1 = vpop.xlane.xlu0 %869 }
 0x1c4   : > { %v1072_v2 = vmul.f32 0.024509804, %v1056_v61  ;;  %v1039_v4 = vadd.f32 %v1023_v62, %v870_v1  ;;  %v1024_v6 = vmul.f32 %v1233_v63, %v940_v0 }
 0x1c6   : > { %1089 = vst.msk [vmem:[%s1663_s11 + $0x48] sm:$0xff] %vm1079_vm3, %v1072_v2  ;;  %v1057_v7 = vadd.f32 %v1655_v46, %v1039_v4 }
 0x1c7   : > { %v872_v8 = vpop.xlane.xlu1 %871  ;;  %v942_v10 = vpop.xlane.xlu0 %941 }
 0x1c8   : > { %v1073_v11 = vmul.f32 0.024509804, %v1057_v7  ;;  %v1040_v12 = vadd.f32 %v1024_v6, %v872_v8  ;;  %v1025_v15 = vmul.f32 %v1234_v9, %v942_v10 }
 0x1ca   : > { %1090 = vst.msk [vmem:[%s1663_s11 + $0x50] sm:$0xff] %vm1079_vm3, %v1073_v11  ;;  %v1058_v14 = vadd.f32 %v1655_v46, %v1040_v12 }
 0x1cb   : > { %v944_v17 = vpop.xlane.xlu1 %943  ;;  %v874_v18 = vpop.xlane.xlu0 %873 }
 0x1cc   : > { %v1074_v19 = vmul.f32 0.024509804, %v1058_v14  ;;  %v1041_v20 = vadd.f32 %v1025_v15, %v874_v18  ;;  %v1026_v22 = vmul.f32 %v1235_v16, %v944_v17 }
 0x1ce   : > { %1091 = vst.msk [vmem:[%s1663_s11 + $0x58] sm:$0xff] %vm1079_vm3, %v1074_v19  ;;  %v1059_v23 = vadd.f32 %v1655_v46, %v1041_v20 }
 0x1cf   : > { %v876_v24 = vpop.xlane.xlu1 %875  ;;  %v946_v26 = vpop.xlane.xlu0 %945 }
 0x1d0   : > { %v1075_v27 = vmul.f32 0.024509804, %v1059_v23  ;;  %v1042_v28 = vadd.f32 %v1026_v22, %v876_v24  ;;  %v1027_v30 = vmul.f32 %v1236_v25, %v946_v26 }
 0x1d2   : > { %1092 = vst.msk [vmem:[%s1663_s11 + $0x60] sm:$0xff] %vm1079_vm3, %v1075_v27  ;;  %v1060_v29 = vadd.f32 %v1655_v46, %v1042_v28 }
 0x1d3   : > { %v948_v34 = vpop.xlane.xlu1 %947  ;;  %v878_v35 = vpop.xlane.xlu0 %877 }
 0x1d4   : > { %v1076_v36 = vmul.f32 0.024509804, %v1060_v29  ;;  %v1043_v37 = vadd.f32 %v1027_v30, %v878_v35  ;;  %v1028_v38 = vmul.f32 %v1237_v3, %v948_v34 }
 0x1d6   : > { %1093 = vst.msk [vmem:[%s1663_s11 + $0x68] sm:$0xff] %vm1079_vm3, %v1076_v36  ;;  %v1061_v39 = vadd.f32 %v1655_v46, %v1043_v37 }
 0x1d7   : > { %v880_v40 = vpop.xlane.xlu1 %879 }
 0x1d8   : > { %v1077_v31 = vmul.f32 0.024509804, %v1061_v39  ;;  %v1044_v33 = vadd.f32 %v1028_v38, %v880_v40 }
 0x1da   : > { %1094 = vst.msk [vmem:[%s1663_s11 + $0x70] sm:$0xff] %vm1079_vm3, %v1077_v31  ;;  %v1062_v41 = vadd.f32 %v1655_v46, %v1044_v33 }
 0x1dc   : > { %v1078_v42 = vmul.f32 0.024509804, %v1062_v41 }
 0x1de   : > { %1095 = vst.msk [vmem:[%s1663_s11 + $0x78] sm:$0xff] %vm1079_vm3, %v1078_v42 }
 0x1df PF: > { %s19_s26 = sadd.s32 1, %s1444_s26  }
 0x1e0   : > { %p16_p2 = scmp.ge.s32.totalorder %s19_s26, 4  }
 0x1e2   :  { %18 = sbr.rel (!%p16_p2) target bundleno = 3 (0x3), region = 89 }
 0x1e7   :  { %1118 = vsyncpa [#allocation4], 1 }
 0x1e8   :  { %1120 = vsyncpa [#allocation4 + $0x1], 1 }

</bundles_post_ra>
